<compile_context>
chip_gen: v7x
topology: tpu7x:2x2x1
jax: 0.10.0
libtpu: 0.0.40
codegen_flags: <defaults>
</compile_context>

<pallas_src>
import functools

import jax
import jax.numpy as jnp
from jax.experimental import pallas as pl
from jax.experimental.pallas import tpu as pltpu


# ----------------------------- helpers --------------------------------------


def _round_up(x: int, m: int) -> int:
    return ((x + m - 1) // m) * m


def _vmem_capacity_bytes() -> int:
    """Physical VMEM of the local TensorCore; conservative default if unknown."""
    try:
        cap = int(getattr(pltpu.get_tpu_info(), "vmem_capacity_bytes"))
        if cap > 0:
            return cap
    except Exception:
        pass
    return 64 * 1024 * 1024  # v7x per-TC VMEM (the smallest generation)


def _sublane_multiple(dtype) -> int:
    # f32 -> 8, bf16 -> 16, int8/fp8 -> 32 (packed sublanes)
    return {4: 8, 2: 16, 1: 32}.get(jnp.dtype(dtype).itemsize, 8)


def _masked_softmax_store(z_f32, o_ref, n_valid: int, n_padded: int):
    """ReLU + numerically stable softmax over the (padded) category axis."""
    z = jnp.maximum(z_f32, 0.0)                    # ReLU
    # Padded columns have logit 0 == ReLU floor, so they never change the max.
    z = z - jnp.max(z, axis=-1, keepdims=True)
    e = jnp.exp(z)
    if n_valid < n_padded:                         # static: drop padded columns
        col = jax.lax.broadcasted_iota(jnp.int32, e.shape, 1)
        e = jnp.where(col < n_valid, e, 0.0)
    denom = jnp.sum(e, axis=-1, keepdims=True)
    # reciprocal + multiply instead of a per-element divide (approx=False keeps
    # full f32 accuracy; flip to approx=True if bf16-level tolerance is OK).
    o_ref[...] = (e * pl.reciprocal(denom, approx=False)).astype(o_ref.dtype)


# ----------------------------- kernels ---------------------------------------


def _fused_kernel(x_ref, wt_ref, o_ref, *, n_valid, n_padded):
    """Fast path: full K per block, W^T resident, no accumulator scratch."""
    z = jnp.dot(x_ref[...], wt_ref[...], preferred_element_type=jnp.float32)
    _masked_softmax_store(z, o_ref, n_valid, n_padded)


def _tiled_kernel(x_ref, wt_ref, o_ref, acc_ref, *, n_valid, n_padded):
    """Fallback: K tiled on the last ('arbitrary') grid axis, f32 accumulator."""
    k = pl.program_id(1)

    @pl.when(k == 0)
    def _init():
        acc_ref[...] = jnp.zeros_like(acc_ref)

    acc_ref[...] += jnp.dot(
        x_ref[...], wt_ref[...], preferred_element_type=jnp.float32
    )

    @pl.when(k == pl.num_programs(1) - 1)
    def _finalize():
        _masked_softmax_store(acc_ref[...], o_ref, n_valid, n_padded)


# ----------------------------- wrappers ---------------------------------------


def prepare_weight(w):
    """One-time weight prep (do at parameter-init time, NOT every forward).

    w: (n_pred_category, in_dim), the nn.Linear(bias=False) weight layout.
    Returns (W^T zero-padded on the category axis to a multiple of 128,
             n_pred_category).  Padding makes output stores lane-dense."""
    n, k = w.shape
    n_pad = _round_up(max(n, 1), 128)
    wt_pad = jnp.pad(w, ((0, n_pad - n), (0, 0))).T  # (in_dim, n_pad)
    return wt_pad, n


def prediction_layer_prepped(x, wt_pad, n_pred_category):
    """Softmax(ReLU(x @ W^T)) with pre-prepared W^T of shape (in_dim, n_pad)."""
    orig_shape = x.shape
    K = orig_shape[-1]
    Kw, N_pad = wt_pad.shape
    assert Kw == K and N_pad % 128 == 0

    M = 1
    for d in orig_shape[:-1]:
        M *= d
    x2 = x.reshape(M, K)

    xb = jnp.dtype(x.dtype).itemsize
    wb = jnp.dtype(wt_pad.dtype).itemsize
    ob = xb
    sub = _sublane_multiple(x.dtype)

    cap = _vmem_capacity_bytes()
    budget = int(cap * 0.7)                 # block budget; leave compiler headroom
    vmem_limit = int(cap * 0.85)
    tm_cap = 1024 if cap >= (100 << 20) else 512   # v5e/v6e vs v7x row-tile cap

    def _row_tile(tm_fit):
        tm = max((tm_fit // sub) * sub, 0)
        if tm < sub:
            return 0
        tm = min(tm_cap, tm, _round_up(M, sub))
        # Keep >=2 row tiles when there is enough work so the 'parallel' axis
        # can shard across both v7x TensorCores.
        if M >= 2 * sub:
            tm = min(tm, _round_up((M + 1) // 2, sub))
        return max(tm, sub)

    # ---------------- fast path: W^T fully resident, no K axis ----------------
    w_bytes = 2 * K * N_pad * wb                   # conservative (double buffers)
    per_row = 2 * K * xb + 2 * N_pad * ob
    tm = _row_tile((budget - w_bytes) // per_row) if budget > w_bytes else 0

    if tm >= sub:
        M_pad = _round_up(M, tm)
        if M_pad != M:
            x2 = jnp.pad(x2, ((0, M_pad - M), (0, 0)))

        out = pl.pallas_call(
            functools.partial(
                _fused_kernel, n_valid=n_pred_category, n_padded=N_pad
            ),
            out_shape=jax.ShapeDtypeStruct((M_pad, N_pad), x.dtype),
            grid_spec=pltpu.PrefetchScalarGridSpec(
                num_scalar_prefetch=0,
                grid=(M_pad // tm,),
                in_specs=[
                    pl.BlockSpec((tm, K), lambda i: (i, 0)),        # X row tile
                    pl.BlockSpec((K, N_pad), lambda i: (0, 0)),     # W^T resident
                ],
                out_specs=pl.BlockSpec((tm, N_pad), lambda i: (i, 0)),
            ),
            compiler_params=pltpu.CompilerParams(
                dimension_semantics=("parallel",),
                vmem_limit_bytes=vmem_limit,
            ),
        )(x2, wt_pad)
    else:
        # -------------- fallback: tile K, accumulate in f32 scratch --------------
        # TODO(synk): for category counts so large that even a (tk, N_pad) W tile
        # does not fit VMEM, a two-pass / online softmax over tiled N is needed.
        tk = 512
        K_pad = _round_up(K, tk)
        w_bytes = 2 * tk * N_pad * wb
        per_row = 2 * tk * xb + 2 * N_pad * ob + N_pad * 4   # + acc scratch
        tm = _row_tile((budget - w_bytes) // per_row) if budget > w_bytes else sub
        tm = max(tm, sub)
        M_pad = _round_up(M, tm)

        x_p = x2
        if M_pad != M or K_pad != K:
            x_p = jnp.pad(x2, ((0, M_pad - M), (0, K_pad - K)))
        wt_p = wt_pad
        if K_pad != K:
            wt_p = jnp.pad(wt_pad, ((0, K_pad - K), (0, 0)))

        out = pl.pallas_call(
            functools.partial(
                _tiled_kernel, n_valid=n_pred_category, n_padded=N_pad
            ),
            out_shape=jax.ShapeDtypeStruct((M_pad, N_pad), x.dtype),
            grid_spec=pltpu.PrefetchScalarGridSpec(
                num_scalar_prefetch=0,
                grid=(M_pad // tm, K_pad // tk),
                in_specs=[
                    pl.BlockSpec((tm, tk), lambda i, k: (i, k)),
                    pl.BlockSpec((tk, N_pad), lambda i, k: (k, 0)),
                ],
                out_specs=pl.BlockSpec((tm, N_pad), lambda i, k: (i, 0)),
                scratch_shapes=[pltpu.VMEM((tm, N_pad), jnp.float32)],
            ),
            compiler_params=pltpu.CompilerParams(
                dimension_semantics=("parallel", "arbitrary"),
                vmem_limit_bytes=vmem_limit,
            ),
        )(x_p, wt_p)

    out = out[:M, :n_pred_category]
    return out.reshape(orig_shape[:-1] + (n_pred_category,))


def prediction_layer(x, w):
    """Convenience entry taking the raw (n_pred_category, in_dim) weight.

    Prefer prepare_weight() once + prediction_layer_prepped() in a real model
    so the pad/transpose is not paid on every forward call."""
    wt_pad, n = prepare_weight(w)
    return prediction_layer_prepped(x, wt_pad, n)


def prediction_layer_ref(x, w):
    """Pure-JAX reference: Softmax(ReLU(x @ w.T))."""
    z = jnp.maximum(
        jnp.einsum("...k,nk->...n", x.astype(jnp.float32), w.astype(jnp.float32)),
        0.0,
    )
    return jax.nn.softmax(z, axis=-1).astype(x.dtype)


if __name__ == "__main__":
    key = jax.random.PRNGKey(0)
    kx, kw = jax.random.split(key)

    batch, in_dim, n_pred_category = 16, 32, 8
    x = jax.random.normal(kx, (batch, in_dim), dtype=jnp.float32)
    # nn.Linear(in_dim, n_pred_category, bias=False) weight layout: (out, in)
    w = jax.random.normal(kw, (n_pred_category, in_dim), dtype=jnp.float32) * 0.1

    wt_pad, n_cat = prepare_weight(w)            # one-time weight prep
    out = prediction_layer_prepped(x, wt_pad, n_cat)
    out = jax.block_until_ready(out)

    ref = prediction_layer_ref(x, w)
    assert out.shape == (batch, n_pred_category)
    assert jnp.allclose(out, ref, atol=1e-5, rtol=1e-5), "mismatch vs reference"
    # Softmax rows must sum to 1.
    assert jnp.allclose(jnp.sum(out, axis=-1), 1.0, atol=1e-5)

    print("KERNEL_OK")
</pallas_src>

<mosaic_0001>
module attributes {stable_mosaic.version = 11 : i64} {
  func.func @_fused_kernel(%arg0: i32, %arg1: memref<8x32xf32, #tpu.memory_space<vmem>>, %arg2: memref<32x128xf32, #tpu.memory_space<vmem>>, %arg3: memref<8x128xf32, #tpu.memory_space<vmem>>) attributes {dimension_semantics = [#tpu.dimension_semantics<parallel>], iteration_bounds = array<i64: 2>, scalar_prefetch = 0 : i64, scratch_operands = 0 : i64, tpu.core_type = #tpu.core_type<tc>, window_params = [{transform_indices = @transform_0, window_bounds = array<i64: 8, 32>}, {pipeline_mode = #tpu.pipeline_mode<synchronous>, transform_indices = @transform_1, window_bounds = array<i64: 32, 128>}, {transform_indices = @transform_2, window_bounds = array<i64: 8, 128>}]} {
    %c0 = arith.constant 0 : index
    %c0_0 = arith.constant 0 : index
    %0 = vector.load %arg1[%c0, %c0_0] : memref<8x32xf32, #tpu.memory_space<vmem>>, vector<8x32xf32>
    %c0_1 = arith.constant 0 : index
    %c0_2 = arith.constant 0 : index
    %1 = vector.load %arg2[%c0_1, %c0_2] : memref<32x128xf32, #tpu.memory_space<vmem>>, vector<32x128xf32>
    %cst = arith.constant dense<0.000000e+00> : vector<8x128xf32>
    %2 = tpu.matmul %0, %1, %cst {dimension_numbers = #tpu.dot_dimension_numbers<[1], [0], [0], [1], [0, 0, 1, 1], [], []>} : vector<8x32xf32>, vector<32x128xf32>, vector<8x128xf32> -> vector<8x128xf32>
    %cst_3 = arith.constant 0.000000e+00 : f32
    %3 = vector.broadcast %cst_3 : f32 to vector<8x128xf32>
    %4 = arith.maximumf %2, %3 : vector<8x128xf32>
    %cst_4 = arith.constant dense<0xFF800000> : vector<8xf32>
    %5 = vector.multi_reduction <maximumf>, %4, %cst_4 [1] : vector<8x128xf32> to vector<8xf32>
    %6 = vector.shape_cast %5 : vector<8xf32> to vector<8x1xf32>
    %7 = vector.broadcast %6 : vector<8x1xf32> to vector<8x128xf32>
    %8 = arith.subf %4, %7 : vector<8x128xf32>
    %9 = math.exp %8 : vector<8x128xf32>
    %10 = tpu.iota {dimensions = array<i32: 1>} : vector<8x128xi32>
    %c8_i32 = arith.constant 8 : i32
    %11 = vector.broadcast %c8_i32 : i32 to vector<8x128xi32>
    %12 = arith.cmpi slt, %10, %11 : vector<8x128xi32>
    %cst_5 = arith.constant 0.000000e+00 : f32
    %13 = vector.broadcast %cst_5 : f32 to vector<8x128xf32>
    %14 = arith.select %12, %9, %13 : vector<8x128xi1>, vector<8x128xf32>
    %cst_6 = arith.constant dense<0.000000e+00> : vector<8xf32>
    %15 = vector.multi_reduction <add>, %14, %cst_6 [1] : vector<8x128xf32> to vector<8xf32>
    %16 = vector.shape_cast %15 : vector<8xf32> to vector<8x1xf32>
    %17 = tpu.reciprocal %16 : vector<8x1xf32> -> vector<8x1xf32>
    %18 = vector.broadcast %17 : vector<8x1xf32> to vector<8x128xf32>
    %19 = arith.mulf %14, %18 : vector<8x128xf32>
    %c0_7 = arith.constant 0 : index
    %c0_8 = arith.constant 0 : index
    %20 = vector.load %arg3[%c0_7, %c0_8] : memref<8x128xf32, #tpu.memory_space<vmem>>, vector<8x128xf32>
    tpu.vector_store %arg3[%c0_7, %c0_8], %19 {strides = array<i32>} : memref<8x128xf32, #tpu.memory_space<vmem>>, vector<8x128xf32>,
    return
  }
  func.func @transform_0(%arg0: i32) -> (i32, i32) {
    %c0_i32 = arith.constant 0 : i32
    %c0_i32_0 = arith.constant 0 : i32
    return %arg0, %c0_i32 : i32, i32
  }
  func.func @transform_1(%arg0: i32) -> (i32, i32) {
    %c0_i32 = arith.constant 0 : i32
    %c0_i32_0 = arith.constant 0 : i32
    %c0_i32_1 = arith.constant 0 : i32
    return %c0_i32, %c0_i32_0 : i32, i32
  }
  func.func @transform_2(%arg0: i32) -> (i32, i32) {
    %c0_i32 = arith.constant 0 : i32
    %c0_i32_0 = arith.constant 0 : i32
    return %arg0, %c0_i32 : i32, i32
  }
}

</mosaic_0001>

<bundles_post_ra>
// kernel: tpu_custom_call.1
= control target key start
LH: loop header
LB: loop body
LE: loop exit
PB: predicated region body
PF: predicated region fallthrough
CT: control target
= control target key end

     0   :  { %7 = vsyncpa [#allocation3], 0  ;;  %s818_s0 = inlined_call_operand.hbm [shape: f32[16,32], index: 0, kind: input, shape index: {}]   ;;  %s819_s1 = inlined_call_operand.hbm [shape: f32[32,128], index: 1, kind: input, shape index: {}]   ;;  %s820_s2 = inlined_call_operand.hbm [shape: f32[16,128], index: 2, kind: output, shape index: {}]  }
   0x1   :  { %9 = vsyncpa [#allocation3 + $0x1], 0 }
   0x2   :  { %10 = vsyncpa [#allocation6], 0 }
   0x3   :  { %11 = vsyncpa [#allocation4], 0 }
   0x4   :  { %13 = vsyncpa [#allocation4 + $0x1], 0  ;;  %s618_s9 = smov 0   ;;  %s620_s10 = smov 0  }
   0x5   :  { %s622_s11 = smov 0   ;;  %s624_s12 = smov 0  }
   0x6 LB: > { %s639_s13 = sadd.s32 4294967295, %s593_s12   ;;  %s362_s14 = sadd.s32 4294967294, %s593_s12   ;;  %s593_s12 = sphi %s624_s12, %s840_s12   ;;  %s589_s11 = sphi %s622_s11, %s839_s11   ;;  %s585_s10 = sphi %s620_s10, %s838_s10   ;;  %s581_s9 = sphi %s618_s9, %s837_s9  }
   0x7   : > { %p39_p0 = scmp.ne.s32.totalorder %s585_s10, %s581_s9  ;;  %p821_p1 = scmp.eq.s32.totalorder %s639_s13, 0 }
   0x8   : > { %p90_p3 = scmp.eq.s32.totalorder %s362_s14, 1  ;;  %p363_p5 = scmp.ge.s32.totalorder %s593_s12, 1 }
   0x9   : > { %p648_p4 = por %p821_p1, %p39_p0  ;;  %p97_p7 = scmp.lt.s32.totalorder %s593_s12, 3 }
   0xa   : > { %p653_p6 = por %p90_p3, %p39_p0  ;;  %s595_s18 = smov [#allocation5]  }
   0xb   : > { %s824_s15 = scalar_select %p648_p4, 1, 0 }
   0xc   : > { %s825_s16 = scalar_select %p653_p6, 1, 0 }
   0xd   : > { %p658_p8 = pnand %p363_p5, %p97_p7  ;;  %s109_s19 = sshll.u32 %s595_s18, 4  ;;  %s662_s19 = int_to_ptr.vmem [resolvable:$true] %s109_s19 }
   0xe   : > { %s674_s21 = sadd.s32 1, %s593_s12   ;;  %s26_s22 = sadd.s32 1, %s589_s11 }
   0xf   : > { %s826_s17 = scalar_select %p658_p8, 1, 0 }
  0x10   : > { %p407_p9 = pneg %p658_p8  ;;  %s23_s23 = ssub.s32 %s593_s12, %s674_s21 }
  0x11   : > { %s465_s26 = scalar_lea.hbm %s819_s1, 512 }
  0x12   : > { %p669_p11 = pnand %p407_p9, %p821_p1  ;;  %p466_p12 = scmp.ne.s32.totalorder %s819_s1, %s465_s26 }
  0x13   : > { %p472_p5 = scmp.lt.u32.totalorder %s465_s26, %s819_s1 }
  0x14   : > { %p467_p13 = pneg %p669_p11 }
  0x16   : > { %p468_p0 = pnand %p467_p13, %p466_p12 }
  0x18   : > { %p469_p3 = pneg %p468_p0 }
  0x1a   : > { %p474_p7 = pnand %p472_p5, %p469_p3 }
  0x1c   : > { %477 = shalt.err (!%p474_p7)
}
  0x1d   : > { %s478_s3 = scalar_lea.vmem %s662_s19, 512  ;;  %p486_p2 = scmp.lt.s32.totalorder %s662_s19, %s662_s19 }
  0x1e   : > { %p479_p9 = scmp.ne.s32.totalorder %s662_s19, %s478_s3  ;;  %p487_p6 = scmp.lt.s32.totalorder %s478_s3, %s478_s3 }
  0x20   : > { %p481_p10 = pnand %p479_p9, %p467_p13  ;;  %p488_p4 = por %p487_p6, %p486_p2 }
  0x22   : > { %p482_p1 = pneg %p481_p10 }
  0x24   : > { %p489_p8 = pnand %p488_p4, %p482_p1 }
  0x26   : > { %492 = shalt.err (!%p489_p8)
}
  0x27   : > { %s596_s4 = smov 128   ;;  %s597_s5 = smov 8  }
  0x28   : > { %410 = dma.hbm_to_vmem [thread:$0]  (!%p669_p11), %s819_s1, 512, %s662_s19, [#allocation6], %s596_s4, %s596_s4, %s597_s5  }
  0x29   : > { %p24_p2 = scmp.eq.s32.totalorder %s23_s23, 0  ;;  %p33_p1 = scmp.ne.s32.totalorder %s589_s11, %s585_s10 }
  0x2a   : > { %p34_p4 = scmp.eq.s32.totalorder %s593_s12, 0  ;;  %p420_p6 = scmp.lt.s32.totalorder %s593_s12, 2 }
  0x2b   : > { %s705_s8 = scalar_select %p24_p2, %s589_s11, %s26_s22  }
  0x2c   : > { %p35_p8 = por %p34_p4, %p33_p1  ;;  %p828_p10 = scmp.eq.s32.totalorder %s639_s13, 1 }
  0x2d   : > { %s123_s18 = sand.u32 1, %s589_s11   ;;  %s367_s24 = sshll.u32 %s593_s12, 7 }
  0x2e   : > { %p709_p12 = por %p828_p10, %p33_p1  ;;  %s366_s25 = sshll.u32 %s123_s18, 3 }
  0x2f   : > { %s718_s27 = scalar_lea.hbm %s818_s0, %s367_s24  ;;  %s127_s19 = scalar_lea.vmem [#allocation2], %s366_s25 }
  0x30   : > { %s134_s22 = sshll.u32 %s127_s19, 4  ;;  %p720_p11 = pnand %p420_p6, %p35_p8  ;;  %s724_s22 = int_to_ptr.vmem [resolvable:$true] %s134_s22 }
  0x31   : > { %s124_s28 = scalar_lea.sflag [#allocation3], %s123_s18  ;;  %s493_s29 = scalar_lea.hbm %s718_s27, 128 }
  0x32   : > { %p494_p13 = scmp.ne.s32.totalorder %s718_s27, %s493_s29  ;;  %p495_p0 = pneg %p720_p11 }
  0x33   : > { %s498_s4 = scalar_lea.hbm %s818_s0, 256  ;;  %p499_p7 = scmp.lt.u32.totalorder %s718_s27, %s818_s0 }
  0x34   : > { %p496_p3 = pnand %p495_p0, %p494_p13  ;;  %p500_p9 = scmp.lt.u32.totalorder %s498_s4, %s493_s29 }
  0x35   : > { %p502_p1 = scmp.lt.u32.totalorder %s493_s29, %s718_s27 }
  0x36   : > { %p497_p5 = pneg %p496_p3  ;;  %p501_p2 = por %p500_p9, %p499_p7 }
  0x38   : > { %p503_p4 = por %p502_p1, %p501_p2 }
  0x3a   : > { %p504_p6 = pnand %p503_p4, %p497_p5 }
  0x3c   : > { %507 = shalt.err (!%p504_p6)
}
  0x3d   : > { %s508_s7 = scalar_lea.vmem %s724_s22, 128  ;;  %s598_s18 = smov [#allocation2]  }
  0x3e   : > { %p509_p8 = scmp.ne.s32.totalorder %s724_s22, %s508_s7  ;;  %s513_s24 = sshll.u32 %s598_s18, 4  ;;  %s514_s24 = int_to_ptr.vmem [resolvable:$false] %s513_s24 }
  0x3f   : > { %s515_s25 = scalar_lea.vmem %s514_s24, 256  ;;  %p516_p3 = scmp.lt.s32.totalorder %s724_s22, %s514_s24 }
  0x40   : > { %p511_p10 = pnand %p509_p8, %p495_p0  ;;  %p517_p7 = scmp.lt.s32.totalorder %s515_s25, %s508_s7 }
  0x42   : > { %p512_p13 = pneg %p511_p10  ;;  %p518_p9 = por %p517_p7, %p516_p3 }
  0x44   : > { %p519_p2 = pnand %p518_p9, %p512_p13 }
  0x46   : > { %522 = shalt.err (!%p519_p2)
}
  0x47   : > { %414 = dma.hbm_to_vmem [thread:$0]  (!%p720_p11), %s718_s27, 128, %s724_s22, %s124_s28  }
  0x48   : > { %p831_p5 = scmp.ne.s32.totalorder %s826_s17, 0 }
  0x49   : > { %s754_s20 = sand.u32 (!%p831_p5), 1, %s585_s10   ;;  %p832_p0 = scmp.ne.s32.totalorder (!%p831_p5), %s824_s15, 0 }
  0x4a   : > { %143 = sbr.rel (%p831_p5) target bundleno = 636 (0x27c), region = 28  ;;  %s369_s26 = sshll.u32 (!%p831_p5), %s754_s20, 3 }
  0x4b   : > { %s146_s19 = scalar_lea.sflag (!%p831_p5), [#allocation3], %s754_s20  ;;  %s149_s29 = scalar_lea.vmem (!%p831_p5), [#allocation2], %s369_s26 }
  0x51   : > { %568 = dma.done.wait (%p832_p0), %s146_s19, 128  }
  0x52   : > { %570 = vsyncadd (%p832_p0), %s146_s19, 4294967168  ;;  %p833_p11 = scmp.eq.s32.totalorder %s639_s13, 0 }
  0x54   : > { %572 = dma.done.wait (%p833_p11), [#allocation6], 512   ;;  %p834_p1 = pmov %p833_p11 }
  0x55   : > { %v599_v0 = vmov 0.0|0.0   ;;  %vm600_vm0 = vmmov 0   ;;  %v601_v1 = vmov 0.0   ;;  %v175_v2 = vld [vmem:[#allocation5] sm:$0xff]  ;;  %v176_v3 = vld [vmem:[#allocation5 + $0x8] sm:$0xff]  ;;  %v177_v4 = vld [vmem:[#allocation5 + $0x10] sm:$0xff]  ;;  %v259_v15 = vlaneseq }
  0x56   : > { %574 = vsyncadd (%p834_p1), [#allocation6], 4294966784  ;;  %393 = vmatprep.subr.bf16.mxu0 %v599_v0  ;;  %390 = vmatprep.mubr.msk.f32.mxu0 %vm600_vm0, %v601_v1  ;;  %v394_v5 = vpack.c.bf16 %v176_v3, %v175_v2  ;;  %v178_v6 = vld [vmem:[#allocation5 + $0x18] sm:$0xff]  ;;  %vm179_vm1 = vcmask 261120   ;;  %s374_s15 = sshll.u32 %s639_s13, 7  ;;  %s173_s17 = scalar_lea.vmem [#allocation7], %s369_s26 }
  0x57   : > { %v397_v7 = vpack.c.bf16 %v178_v6, %v177_v4  ;;  %v174_v8 = vld [vmem:[%s149_s29] sm:$0xff]  ;;  %v260_v16 = vand.u32 127, %v259_v15  ;;  %s282_s27 = sshll.u32 %s173_s17, 4  ;;  %s774_s28 = scalar_lea.hbm %s820_s2, %s374_s15  ;;  %s776_s27 = int_to_ptr.vmem [resolvable:$true] %s282_s27 }
  0x58   : > { %395 = vmatpush3.bf16.msra.mxu0 %v394_v5  ;;  %s269_s30 = scalar_lea.sflag [#allocation4], %s754_s20  ;;  %s523_s3 = scalar_lea.vmem %s776_s27, 128 }
  0x59   : > { %396 = vmatprep.subr.bf16.mxu0 %v599_v0  ;;  %vm261_vm2 = vcmp.lt.s32.totalorder %v260_v16, 8  ;;  %p524_p4 = scmp.ne.s32.totalorder %s776_s27, %s523_s3  ;;  %s602_s13 = smov [#allocation7]  }
  0x5a   : > { %s527_s4 = sshll.u32 %s602_s13, 4  ;;  %s528_s4 = int_to_ptr.vmem [resolvable:$false] %s527_s4 }
  0x5b   : > { %p525_p6 = pnand %p524_p4, %p709_p12  ;;  %s529_s5 = scalar_lea.vmem %s528_s4, 256 }
  0x5c   : > { %398 = vmatpush3.bf16.msra.mxu0 %v397_v7  ;;  %p530_p10 = scmp.lt.s32.totalorder %s776_s27, %s528_s4  ;;  %p531_p13 = scmp.lt.s32.totalorder %s529_s5, %s523_s3 }
  0x5d   : > { %p526_p8 = pneg %p525_p6 }
  0x5e   : > { %p532_p3 = por %p531_p13, %p530_p10 }
  0x5f   : > { %391 = vmatmul.mubr.msk.f32.vlgmr.msra.gmra.mrb[0].mxu0 %vm179_vm1, %v174_v8 }
  0x60   : > { %p533_p7 = pnand %p532_p3, %p526_p8 }
 0x132   : > { %v249_v9 = vpop.f32.mrb[0].mxu0 }
 0x133   : > { %v253_v10 = vmax.f32 %v249_v9, 0.0  ;;  %v392_v11 = vpop.f32.mrb[1].mxu0 }
 0x135   : > { %254 = vmax.xlane.f32.xlu0 %v253_v10 }
 0x1c2   : > { %v255_v12 = vpop.xlane.xlu0 %254 }
 0x1c3   : > { %v256_v13 = vsub.f32 %v253_v10, %v255_v12 }
 0x1c5   : > { %v257_v14 = vmul.f32 1.442695, %v256_v13 }
 0x1c7   : > { %461 = vpow2.f32 %v257_v14 }
 0x1d1   : > { %v462_v17 = vpop.eup %461 }
 0x1d2   : > { %v262_v18 = vsel %vm261_vm2, %v462_v17, 0.0 }
 0x1d3   : > { %263 = vadd.xlane.f32.xlu0 %v262_v18 }
 0x260   : > { %v264_v19 = vpop.xlane.xlu0 %263 }
 0x261   : > { %463 = vrcp.f32 %v264_v19 }
 0x26b   : > { %v464_v20 = vpop.eup %463 }
 0x26c   : > { %v266_v21 = vmul.f32 %v464_v20, %v262_v18 }
 0x26e   : > { %267 = vst [vmem:[%s173_s17] sm:$0xff] %v266_v21 }
 0x26f   : > { %536 = shalt.err (!%p533_p7)
}
 0x270   : > { %s537_s6 = scalar_lea.hbm %s774_s28, 128  ;;  %s541_s24 = scalar_lea.hbm %s820_s2, 256 }
 0x271   : > { %p538_p9 = scmp.ne.s32.totalorder %s774_s28, %s537_s6  ;;  %p542_p0 = scmp.lt.u32.totalorder %s774_s28, %s820_s2 }
 0x272   : > { %p543_p11 = scmp.lt.u32.totalorder %s541_s24, %s537_s6  ;;  %p545_p4 = scmp.lt.u32.totalorder %s537_s6, %s774_s28 }
 0x273   : > { %p539_p2 = pnand %p538_p9, %p709_p12 }
 0x274   : > { %p544_p1 = por %p543_p11, %p542_p0 }
 0x275   : > { %p540_p5 = pneg %p539_p2 }
 0x276   : > { %p546_p6 = por %p545_p4, %p544_p1 }
 0x278   : > { %p547_p8 = pnand %p546_p6, %p540_p5 }
 0x27a   : > { %550 = shalt.err (!%p547_p8)
}
 0x27b   : > { %405 = dma.vmem_to_hbm [thread:$0]  (%p709_p12), %s776_s27, 128, %s774_s28, %s269_s30  }
 0x27c PF: > { %s294_s26 = sand.u32 1, %s581_s9   ;;  %p835_p10 = scmp.ne.s32.totalorder %s825_s16, 0 }
 0x27d   : > { %p836_p13 = scmp.ge.s32.totalorder %s593_s12, 2  ;;  %s295_s19 = scalar_lea.sflag [#allocation4], %s294_s26 }
 0x27f   : > { %p416_p3 = pnand %p836_p13, %p835_p10 }
 0x281   : > { %576 = dma.done.wait (!%p416_p3), %s295_s19, 128  }
 0x282   : > { %578 = vsyncadd (!%p416_p3), %s295_s19, 4294967168  ;;  %p16_p7 = scmp.ge.s32.totalorder %s674_s21, 4   ;;  %s837_s9 = smov %s585_s10 }
 0x283   : > { %s838_s10 = smov %s589_s11  ;;  %s839_s11 = smov %s705_s8 }
 0x284   : > { %s840_s12 = smov %s674_s21  ;;  %18 = sbr.rel (!%p16_p7) target bundleno = 6 (0x6), region = 77 }
 0x28b   :  { %300 = vsyncpa [#allocation3], 1 }
 0x28c   :  { %302 = vsyncpa [#allocation3 + $0x1], 1 }
 0x28d   :  { %303 = vsyncpa [#allocation6], 1 }
 0x28e   :  { %304 = vsyncpa [#allocation4], 1 }
 0x28f   :  { %306 = vsyncpa [#allocation4 + $0x1], 1 }

</bundles_post_ra>
